<compile_context>
chip_gen: v6e
topology: v6e:2x2x1
jax: 0.10.0
libtpu: 0.0.40
codegen_flags: <defaults>
</compile_context>

<pallas_src>
import functools
import math

import numpy as np
import jax
import jax.numpy as jnp
from jax.experimental import pallas as pl
from jax.experimental.pallas import tpu as pltpu


def _round_up(x, m):
    return ((x + m - 1) // m) * m


# --------------------------------------------------------------------------
# Kernel 1 (default): outer-product lift -> one full-depth matmul per tile.
# --------------------------------------------------------------------------
def _wdk_phi_kernel(p1_ref, p2_ref, r1_ref, r2_ref, out_ref):
    """out = (Phi1_tile @ Phi2_tile^T) * r1 * r2.

    p1_ref : (tm, D2) bf16   Phi1 row tile   (D2 = (L*d)^2)
    p2_ref : (tn, D2) bf16   Phi2 col tile
    r1_ref : (tm, 1)  f32    a^2 * rsqrt(k1)
    r2_ref : (1, tn)  f32    rsqrt(k2)
    out_ref: (tm, tn) f32
    """
    k = jax.lax.dot_general(
        p1_ref[...], p2_ref[...],
        dimension_numbers=(((1,), (1,)), ((), ())),
        preferred_element_type=jnp.float32)
    # Fused epilogue: two broadcast multiplies, free under the matmul.
    out_ref[...] = k * r1_ref[...] * r2_ref[...]


# --------------------------------------------------------------------------
# Kernel 2 (fallback for large L*d): W-eigendecomposition form.
#   K = sum_r lam[r] * t_r^2,   t_r = (F1 * Qexp[r]) @ F2^T
# --------------------------------------------------------------------------
def _wdk_eig_kernel(f1_ref, f2_ref, qexp_ref, lam_ref, r1_ref, r2_ref, out_ref,
                    *, L, tm_sub, tn_sub):
    """f1_ref (tm, L*d) f32, f2_ref (tn, L*d) f32, qexp_ref (L, L*d) f32,
    lam_ref (L,) f32 in SMEM, r1_ref (tm,1), r2_ref (1,tn), out_ref (tm,tn)."""
    tm, tn = out_ref.shape
    nbi = tm // tm_sub
    nbj = tn // tn_sub
    # Register-friendly sub-tiles: acc/t stay small across the whole r loop and
    # the output sub-tile is stored exactly once.  All operand slices come from
    # the Refs (plain addressed VMEM loads), never from materialized values.
    for bi in range(nbi):
        f1b = f1_ref[pl.ds(bi * tm_sub, tm_sub), :]          # (tm_sub, L*d)
        r1b = r1_ref[pl.ds(bi * tm_sub, tm_sub), :]          # (tm_sub, 1)
        for bj in range(nbj):
            f2b = f2_ref[pl.ds(bj * tn_sub, tn_sub), :]      # (tn_sub, L*d)
            acc = jnp.zeros((tm_sub, tn_sub), jnp.float32)
            for r in range(L):
                # Scale the smaller operand in f32 (v5e VPU has no bf16).
                f1w = f1b * qexp_ref[r:r + 1, :]
                t = jax.lax.dot_general(
                    f1w, f2b,
                    dimension_numbers=(((1,), (1,)), ((), ())),
                    preferred_element_type=jnp.float32)      # (tm_sub, tn_sub)
                acc = acc + lam_ref[r] * (t * t)
            r2b = r2_ref[:, pl.ds(bj * tn_sub, tn_sub)]       # (1, tn_sub)
            out_ref[pl.ds(bi * tm_sub, tm_sub),
                    pl.ds(bj * tn_sub, tn_sub)] = acc * r1b * r2b


# --------------------------------------------------------------------------
# Wrapper
# --------------------------------------------------------------------------
def soft_series_wdk(X1, X2, A, w, a, *, tm=256, tn=1024, tm_sub=128, tn_sub=256,
                    use_phi=None, phi_max_features=4096):
    """SoftSeriesWDK.forward(X1, X2) with the O(n1*n2) hot path in Pallas.

    X1: (n1, L) int32, X2: (n2, L) int32, A: (L, n_S, sub_dim) f32,
    w: (L*(L-1)//2,) f32, a: scalar amplitude.  Returns (n1, n2) f32.
    """
    n1, L = X1.shape
    n2, L2 = X2.shape
    assert L == L2
    _, n_S, d = A.shape
    Ld = L * d
    A = A.astype(jnp.float32)

    # ---- small / data-dependent preprocessing in XLA (no clean Pallas equiv.) ----
    # Symmetric soft weight matrix W = sigmoid(symmetrize(w)); diagonal = 0.5.
    i_x, i_y = np.tril_indices(L, k=-1)
    W = jnp.zeros((L, L), jnp.float32)
    if len(i_x):
        W = W.at[i_x, i_y].set(w).at[i_y, i_x].set(w)
    W = jax.nn.sigmoid(W)

    # Per-position embedding gather: E[i, l, :] = A[l, X[i, l], :].
    # TODO(synk): data-dependent gather has no BlockSpec equivalent; kept in XLA.
    l_idx = jnp.arange(L)[None, :]
    E1 = A[l_idx, X1, :]                                   # (n1, L, d)
    E2 = A[l_idx, X2, :]                                   # (n2, L, d)
    F1 = E1.reshape(n1, Ld)                                # lane-friendly flat layout
    F2 = E2.reshape(n2, Ld)

    # Normalisers k1, k2 (exact f32 elementwise) and fused rsqrt scale factors.
    # (Reference semantics kept: k == 0 still yields inf, exactly like PyTorch.)
    sd1 = jnp.sum(E1 * E1, axis=-1)                        # (n1, L)
    sd2 = jnp.sum(E2 * E2, axis=-1)                        # (n2, L)
    k1 = jnp.sum(sd1[:, :, None] * W[None] * sd1[:, None, :], axis=(1, 2))
    k2 = jnp.sum(sd2[:, :, None] * W[None] * sd2[:, None, :], axis=(1, 2))
    a2 = jnp.float32(a) ** 2
    r1 = (a2 * jax.lax.rsqrt(k1)).astype(jnp.float32)      # (n1,)
    r2 = jax.lax.rsqrt(k2).astype(jnp.float32)             # (n2,)

    # ---- 8/128-aligned tiles + zero padding (lane-dense stores), crop at end ----
    tm = min(tm, _round_up(n1, 8))
    tn = min(tn, _round_up(n2, 128))
    n1p = _round_up(n1, tm)
    n2p = _round_up(n2, tn)
    F1p = jnp.pad(F1, ((0, n1p - n1), (0, 0)))
    F2p = jnp.pad(F2, ((0, n2p - n2), (0, 0)))
    # Padded rows get r = 0 -> padded outputs are finite zeros (cropped anyway).
    r1p = jnp.pad(r1, (0, n1p - n1)).reshape(n1p, 1)
    r2p = jnp.pad(r2, (0, n2p - n2)).reshape(1, n2p)

    grid = (n1p // tm, n2p // tn)
    # NOTE(v7x): both axes "parallel" -> grid is sharded across the 2 TCs.
    cparams = pltpu.CompilerParams(
        dimension_semantics=("parallel", "parallel"),
        vmem_limit_bytes=48 * 1024 * 1024)

    if use_phi is None:
        use_phi = (Ld * Ld) <= phi_max_features

    if use_phi:
        # Outer-product lift: K[i,j] = <Phi1[i], Phi2[j]>, contraction (L*d)^2.
        D2 = Ld * Ld
        Wkron = jnp.repeat(jnp.repeat(W, d, axis=0), d, axis=1)      # (Ld, Ld)
        Phi1 = (F1p[:, :, None] * F1p[:, None, :] * Wkron[None]).reshape(n1p, D2)
        Phi2 = (F2p[:, :, None] * F2p[:, None, :]).reshape(n2p, D2)
        # bf16 operands: default-precision f32 matmuls round to bf16 anyway;
        # this just halves HBM/VMEM bytes and operand vreg footprint.
        Phi1 = Phi1.astype(jnp.bfloat16)
        Phi2 = Phi2.astype(jnp.bfloat16)

        flops = 2 * n1p * n2p * D2 + 3 * n1p * n2p
        bytes_accessed = 2 * (n1p + n2p) * D2 + 4 * n1p * n2p + 4 * (n1p + n2p)

        out = pl.pallas_call(
            _wdk_phi_kernel,
            out_shape=jax.ShapeDtypeStruct((n1p, n2p), jnp.float32),
            grid=grid,
            in_specs=[
                pl.BlockSpec((tm, D2), lambda i, j: (i, 0)),   # Phi1 row tile
                pl.BlockSpec((tn, D2), lambda i, j: (j, 0)),   # Phi2 col tile
                pl.BlockSpec((tm, 1), lambda i, j: (i, 0)),    # a^2 * rsqrt(k1)
                pl.BlockSpec((1, tn), lambda i, j: (0, j)),    # rsqrt(k2)
            ],
            out_specs=pl.BlockSpec((tm, tn), lambda i, j: (i, j)),
            compiler_params=cparams,
            cost_estimate=pl.CostEstimate(
                flops=int(flops), transcendentals=0,
                bytes_accessed=int(bytes_accessed)),
        )(Phi1, Phi2, r1p, r2p)
    else:
        # Eigendecomposition of the tiny symmetric (L, L) soft-weight matrix.
        lam, Q = jnp.linalg.eigh(W)                          # W = Q diag(lam) Q^T
        lam = lam.astype(jnp.float32)                        # (L,)
        Qexp = jnp.repeat(Q.T, d, axis=1).astype(jnp.float32)  # (L, Ld)

        tm_s = math.gcd(tm, tm_sub)                          # divisor of tm, mult of 8
        tn_s = math.gcd(tn, tn_sub)                          # divisor of tn, mult of 128

        flops = n1p * n2p * L * (2 * Ld + 3) + 2 * n1p * n2p
        bytes_accessed = 4 * ((n1p + n2p) * Ld + n1p * n2p + n1p + n2p + L * Ld + L)

        out = pl.pallas_call(
            functools.partial(_wdk_eig_kernel, L=L, tm_sub=tm_s, tn_sub=tn_s),
            out_shape=jax.ShapeDtypeStruct((n1p, n2p), jnp.float32),
            grid=grid,
            in_specs=[
                pl.BlockSpec((tm, Ld), lambda i, j: (i, 0)),   # F1 row tile
                pl.BlockSpec((tn, Ld), lambda i, j: (j, 0)),   # F2 col tile
                pl.BlockSpec((L, Ld), lambda i, j: (0, 0)),    # Qexp (tiny, whole)
                pl.BlockSpec(memory_space=pltpu.MemorySpace.SMEM),  # lam scalars
                pl.BlockSpec((tm, 1), lambda i, j: (i, 0)),    # a^2 * rsqrt(k1)
                pl.BlockSpec((1, tn), lambda i, j: (0, j)),    # rsqrt(k2)
            ],
            out_specs=pl.BlockSpec((tm, tn), lambda i, j: (i, j)),
            compiler_params=cparams,
            cost_estimate=pl.CostEstimate(
                flops=int(flops), transcendentals=0,
                bytes_accessed=int(bytes_accessed)),
        )(F1p, F2p, Qexp, lam, r1p, r2p)

    return out[:n1, :n2]


# --------------------------------------------------------------------------
# Pure-JAX reference (exact-f32 elementwise transliteration of the module)
# --------------------------------------------------------------------------
def _reference(X1, X2, A, w, a):
    n1, L = X1.shape
    n2, _ = X2.shape
    A = A.astype(jnp.float32)
    i_x, i_y = np.tril_indices(L, k=-1)
    W = jnp.zeros((L, L), jnp.float32)
    if len(i_x):
        W = W.at[i_x, i_y].set(w).at[i_y, i_x].set(w)
    W = jax.nn.sigmoid(W)

    S = jnp.sum(A[:, :, None, :] * A[:, None, :, :], axis=-1)       # (L, n_S, n_S)
    l_idx = jnp.arange(L)

    def wdk(subs):                                                   # (..., L) -> (...,)
        return jnp.sum(subs[..., :, None] * W * subs[..., None, :], axis=(-2, -1))

    k1 = wdk(S[l_idx, X1, X1])[:, None]                              # (n1, 1)
    k2 = wdk(S[l_idx, X2, X2])[None, :]                              # (1, n2)
    subs = S[l_idx[None, None, :], X1[:, None, :], X2[None, :, :]]   # (n1, n2, L)
    K = wdk(subs)                                                    # (n1, n2)
    K = K / jnp.sqrt(k1) / jnp.sqrt(k2)
    return (jnp.float32(a) ** 2) * K


if __name__ == "__main__":
    key = jax.random.PRNGKey(0)
    k_a, k_w, k_x1, k_x2 = jax.random.split(key, 4)

    # Small shapes implied by the module: integer sequences of length L over an
    # alphabet of n_S symbols, one (n_S, sub_dim) factor per position.
    L, n_S, sub_dim = 8, 5, 4
    n1, n2 = 48, 200          # deliberately not tile-aligned: exercises pad + crop
    a = 1.3

    A = jax.random.normal(k_a, (L, n_S, sub_dim), dtype=jnp.float32)
    w = 0.5 * jax.random.normal(k_w, (L * (L - 1) // 2,), dtype=jnp.float32)
    X1 = jax.random.randint(k_x1, (n1, L), 0, n_S, dtype=jnp.int32)
    X2 = jax.random.randint(k_x2, (n2, L), 0, n_S, dtype=jnp.int32)

    K_ref = _reference(X1, X2, A, w, a)

    # Path 1 (default here, (L*d)^2 = 1024): outer-product lift, one full-depth matmul.
    K_phi = jax.block_until_ready(soft_series_wdk(X1, X2, A, w, a, use_phi=True))
    # Path 2 (fallback for large L*d): W-eigendecomposition with sub-tiled accumulation.
    K_eig = jax.block_until_ready(soft_series_wdk(X1, X2, A, w, a, use_phi=False))

    for name, K in (("phi", K_phi), ("eig", K_eig)):
        assert K.shape == (n1, n2), (name, K.shape)
        err = float(jnp.max(jnp.abs(K - K_ref)))
        # MXU default precision / explicit bf16 operands round to bf16, so allow a
        # small tolerance against the exact-f32 elementwise reference.
        assert jnp.allclose(K, K_ref, rtol=2e-2, atol=2e-3), (name, err)

    print("KERNEL_OK")
</pallas_src>

<mosaic_0001>
module attributes {stable_mosaic.version = 11 : i64} {
  func.func @_wdk_phi_kernel(%arg0: i32, %arg1: i32, %arg2: memref<48x1024xbf16, #tpu.memory_space<vmem>>, %arg3: memref<256x1024xbf16, #tpu.memory_space<vmem>>, %arg4: memref<48x1xf32, #tpu.memory_space<vmem>>, %arg5: memref<1x256xf32, #tpu.memory_space<vmem>>, %arg6: memref<48x256xf32, #tpu.memory_space<vmem>>) attributes {dimension_semantics = [#tpu.dimension_semantics<parallel>, #tpu.dimension_semantics<parallel>], iteration_bounds = array<i64: 1, 1>, scalar_prefetch = 0 : i64, scratch_operands = 0 : i64, tpu.core_type = #tpu.core_type<tc>, window_params = [{transform_indices = @transform_0, window_bounds = array<i64: 48, 1024>}, {transform_indices = @transform_1, window_bounds = array<i64: 256, 1024>}, {transform_indices = @transform_2, window_bounds = array<i64: 48, 1>}, {transform_indices = @transform_3, window_bounds = array<i64: 1, 256>}, {transform_indices = @transform_4, window_bounds = array<i64: 48, 256>}]} {
    %c0 = arith.constant 0 : index
    %c0_0 = arith.constant 0 : index
    %0 = vector.load %arg2[%c0, %c0_0] : memref<48x1024xbf16, #tpu.memory_space<vmem>>, vector<48x1024xbf16>
    %c0_1 = arith.constant 0 : index
    %c0_2 = arith.constant 0 : index
    %1 = vector.load %arg3[%c0_1, %c0_2] : memref<256x1024xbf16, #tpu.memory_space<vmem>>, vector<256x1024xbf16>
    %cst = arith.constant dense<0.000000e+00> : vector<48x256xf32>
    %2 = tpu.matmul %0, %1, %cst {dimension_numbers = #tpu.dot_dimension_numbers<[1], [1], [0], [0], [0, 0, 1, 0], [], []>} : vector<48x1024xbf16>, vector<256x1024xbf16>, vector<48x256xf32> -> vector<48x256xf32>
    %c0_3 = arith.constant 0 : index
    %c0_4 = arith.constant 0 : index
    %3 = vector.load %arg4[%c0_3, %c0_4] : memref<48x1xf32, #tpu.memory_space<vmem>>, vector<48x1xf32>
    %4 = vector.broadcast %3 : vector<48x1xf32> to vector<48x256xf32>
    %5 = arith.mulf %2, %4 : vector<48x256xf32>
    %c0_5 = arith.constant 0 : index
    %c0_6 = arith.constant 0 : index
    %6 = vector.load %arg5[%c0_5, %c0_6] : memref<1x256xf32, #tpu.memory_space<vmem>>, vector<1x256xf32>
    %7 = vector.broadcast %6 : vector<1x256xf32> to vector<48x256xf32>
    %8 = arith.mulf %5, %7 : vector<48x256xf32>
    %c0_7 = arith.constant 0 : index
    %c0_8 = arith.constant 0 : index
    %9 = vector.load %arg6[%c0_7, %c0_8] : memref<48x256xf32, #tpu.memory_space<vmem>>, vector<48x256xf32>
    tpu.vector_store %arg6[%c0_7, %c0_8], %8 {strides = array<i32>} : memref<48x256xf32, #tpu.memory_space<vmem>>, vector<48x256xf32>,
    return
  }
  func.func @transform_0(%arg0: i32, %arg1: i32) -> (i32, i32) {
    %c0_i32 = arith.constant 0 : i32
    %c0_i32_0 = arith.constant 0 : i32
    return %arg0, %c0_i32 : i32, i32
  }
  func.func @transform_1(%arg0: i32, %arg1: i32) -> (i32, i32) {
    %c0_i32 = arith.constant 0 : i32
    %c0_i32_0 = arith.constant 0 : i32
    return %arg1, %c0_i32 : i32, i32
  }
  func.func @transform_2(%arg0: i32, %arg1: i32) -> (i32, i32) {
    %c0_i32 = arith.constant 0 : i32
    %c0_i32_0 = arith.constant 0 : i32
    return %arg0, %c0_i32 : i32, i32
  }
  func.func @transform_3(%arg0: i32, %arg1: i32) -> (i32, i32) {
    %c0_i32 = arith.constant 0 : i32
    %c0_i32_0 = arith.constant 0 : i32
    return %c0_i32, %arg1 : i32, i32
  }
  func.func @transform_4(%arg0: i32, %arg1: i32) -> (i32, i32) {
    %c0_i32 = arith.constant 0 : i32
    return %arg0, %arg1 : i32, i32
  }
}

</mosaic_0001>

<bundles_post_ra>
// kernel: tpu_custom_call.1
= control target key start
LH: loop header
LB: loop body
LE: loop exit
PB: predicated region body
PF: predicated region fallthrough
CT: control target
= control target key end

     0   :  { %9 = vsyncpa [#allocation3], 0  ;;  %s1687_s0 = inlined_call_operand.hbm [shape: bf16[48,1024], index: 0, kind: input, shape index: {}]   ;;  %s1688_s1 = inlined_call_operand.hbm [shape: bf16[256,1024], index: 1, kind: input, shape index: {}]   ;;  %s1689_s2 = inlined_call_operand.vmem [shape: f32[48,1], index: 2, kind: input, shape index: {}]   ;;  %s1690_s3 = inlined_call_operand.vmem [shape: f32[1,256], index: 3, kind: input, shape index: {}]   ;;  %s1691_s4 = inlined_call_operand.hbm [shape: f32[48,256], index: 4, kind: output, shape index: {}]  }
   0x1   :  { %10 = vsyncpa [#allocation6], 0 }
   0x2   :  { %11 = vsyncpa [#allocation4], 0  ;;  %s1540_s15 = smov [#allocation2]  }
   0x3   :  { %s17_s16 = sshll.u32 %s1540_s15, 4  ;;  %s18_s16 = int_to_ptr.vmem [resolvable:$true] %s17_s16 }
   0x4   :  { %s1482_s17 = scalar_lea.vmem %s18_s16, 3072  ;;  %p1487_p1 = scmp.lt.s32.totalorder %s18_s16, %s18_s16 }
   0x5   :  { %p1483_p0 = scmp.ne.s32.totalorder %s18_s16, %s1482_s17  ;;  %p1488_p2 = scmp.lt.s32.totalorder %s1482_s17, %s1482_s17 }
   0x7   :  { %p1489_p3 = por %p1488_p2, %p1487_p1 }
   0x9   :  { %p1490_p4 = pnand %p1489_p3, %p1483_p0 }
   0xb   :  { %1493 = shalt.err (!%p1490_p4)
}
   0xc   :  { %s1541_s18 = smov 512   ;;  %s1542_s19 = smov 32  }
   0xd   :  { %23 = dma.hbm_to_vmem [thread:$0]  %s1687_s0, 3072, %s18_s16, [#allocation3], %s1541_s18, %s1541_s18, %s1542_s19  }
   0xe   :  { %s1543_s22 = smov [#allocation5]  }
   0xf   :  { %s29_s23 = sshll.u32 %s1543_s22, 4  ;;  %s30_s23 = int_to_ptr.vmem [resolvable:$true] %s29_s23 }
  0x10   :  { %s1502_s24 = scalar_lea.vmem %s30_s23, 16384  ;;  %p1507_p6 = scmp.lt.s32.totalorder %s30_s23, %s30_s23 }
  0x11   :  { %p1503_p5 = scmp.ne.s32.totalorder %s30_s23, %s1502_s24  ;;  %p1508_p7 = scmp.lt.s32.totalorder %s1502_s24, %s1502_s24 }
  0x13   :  { %p1509_p8 = por %p1508_p7, %p1507_p6 }
  0x15   :  { %p1510_p9 = pnand %p1509_p8, %p1503_p5 }
  0x17   :  { %1513 = shalt.err (!%p1510_p9)
}
  0x18   :  { %35 = dma.hbm_to_vmem [thread:$0]  %s1688_s1, 16384, %s30_s23, [#allocation6], %s1541_s18, %s1541_s18, %s1542_s19  }
  0x19   :  { %1534 = dma.done.wait [#allocation3], 3072  }
  0x1a   :  { %1535 = vsyncadd [#allocation3], 4294964224 }
  0x1b   :  { %1536 = dma.done.wait [#allocation6], 16384  }
  0x1c   :  { %1537 = vsyncadd [#allocation6], 4294950912  ;;  %v126_v0 = vld [vmem:[#allocation5 + $0x1c0] sm:$0xff]  ;;  %v127_v2 = vld [vmem:[#allocation5 + $0x1c8] sm:$0xff] }
  0x1d   :  { %v130_v1 = vld [vmem:[#allocation5 + $0x1e0] sm:$0xff]  ;;  %v131_v4 = vld [vmem:[#allocation5 + $0x1e8] sm:$0xff] }
  0x1e   :  { %v1393_v3 = vcombine.high %v126_v0, %v130_v1  ;;  %v1392_v5 = vcombine.low %v126_v0, %v130_v1  ;;  %v118_v6 = vld [vmem:[#allocation5 + $0x180] sm:$0xff]  ;;  %v1395_v8 = vcombine.high %v127_v2, %v131_v4  ;;  %v1394_v9 = vcombine.low %v127_v2, %v131_v4  ;;  %v119_v11 = vld [vmem:[#allocation5 + $0x188] sm:$0xff] }
  0x1f   :  { %v122_v7 = vld [vmem:[#allocation5 + $0x1a0] sm:$0xff]  ;;  %v123_v12 = vld [vmem:[#allocation5 + $0x1a8] sm:$0xff] }
  0x20   :  { %v1385_v10 = vcombine.high %v118_v6, %v122_v7  ;;  %958 = vmatprep.subr.bf16.mxu0 %v1393_v3  ;;  %v1387_v13 = vcombine.high %v119_v11, %v123_v12  ;;  %1021 = vmatprep.subr.bf16.mxu1 %v1395_v8  ;;  %v110_v14 = vld [vmem:[#allocation5 + $0x140] sm:$0xff]  ;;  %v111_v16 = vld [vmem:[#allocation5 + $0x148] sm:$0xff]  ;;  %v1384_v18 = vcombine.low %v118_v6, %v122_v7 }
  0x21   :  { %959 = vmatpush1.bf16.xpose.msra.mxu0 %v1392_v5  ;;  %1022 = vmatpush1.bf16.xpose.msra.mxu1 %v1394_v9  ;;  %v114_v15 = vld [vmem:[#allocation5 + $0x160] sm:$0xff]  ;;  %v115_v17 = vld [vmem:[#allocation5 + $0x168] sm:$0xff]  ;;  %v1386_v19 = vcombine.low %v119_v11, %v123_v12 }
  0x22   :  { %960 = vmatprep.subr.bf16.mxu0 %v1385_v10  ;;  %1023 = vmatprep.subr.bf16.mxu1 %v1387_v13  ;;  %v1377_v20 = vcombine.high %v110_v14, %v114_v15  ;;  %v1379_v21 = vcombine.high %v111_v16, %v115_v17  ;;  %v102_v22 = vld [vmem:[#allocation5 + $0x100] sm:$0xff]  ;;  %v103_v24 = vld [vmem:[#allocation5 + $0x108] sm:$0xff]  ;;  %v1376_v26 = vcombine.low %v110_v14, %v114_v15 }
  0x23   :  { %v106_v23 = vld [vmem:[#allocation5 + $0x120] sm:$0xff]  ;;  %v107_v25 = vld [vmem:[#allocation5 + $0x128] sm:$0xff]  ;;  %v1378_v27 = vcombine.low %v111_v16, %v115_v17 }
  0x24   :  { %v1369_v28 = vcombine.high %v102_v22, %v106_v23  ;;  %v1371_v29 = vcombine.high %v103_v24, %v107_v25  ;;  %v94_v30 = vld [vmem:[#allocation5 + $0xc0] sm:$0xff]  ;;  %v1587_v36 = vld [vmem:[#allocation2 + $0x8] sm:$0xff]  ;;  %v1368_v42 = vcombine.low %v102_v22, %v106_v23  ;;  %v1370_v43 = vcombine.low %v103_v24, %v107_v25 }
  0x25   :  { %v1579_v31 = vld [vmem:[#allocation2] sm:$0xff]  ;;  %v1589_v37 = vld [vmem:[#allocation2 + $0x28] sm:$0xff] }
  0x26   :  { %v1581_v32 = vld [vmem:[#allocation2 + $0x20] sm:$0xff]  ;;  %v95_v38 = vld [vmem:[#allocation5 + $0xc8] sm:$0xff]  ;;  %v1314_v40 = vcombine.low %v1587_v36, %v1589_v37  ;;  %v1315_v41 = vcombine.high %v1587_v36, %v1589_v37 }
  0x27   :  { %v98_v33 = vld [vmem:[#allocation5 + $0xe0] sm:$0xff]  ;;  %v1312_v34 = vcombine.low %v1579_v31, %v1581_v32  ;;  %v1313_v35 = vcombine.high %v1579_v31, %v1581_v32  ;;  %v99_v39 = vld [vmem:[#allocation5 + $0xe8] sm:$0xff] }
  0x28   :  { %v1361_v44 = vcombine.high %v94_v30, %v98_v33  ;;  %1053 = vmatprep.mubr.bf16.mxu1 %v1315_v41  ;;  %v1363_v45 = vcombine.high %v95_v38, %v99_v39  ;;  %v86_v46 = vld [vmem:[#allocation5 + $0x80] sm:$0xff]  ;;  %v87_v48 = vld [vmem:[#allocation5 + $0x88] sm:$0xff]  ;;  %v1360_v50 = vcombine.low %v94_v30, %v98_v33  ;;  %v1362_v51 = vcombine.low %v95_v38, %v99_v39 }
  0x29   :  { %961 = vmatpush1.bf16.xpose.msra.mxu0 %v1384_v18  ;;  %1024 = vmatpush1.bf16.xpose.msra.mxu1 %v1386_v19  ;;  %v90_v47 = vld [vmem:[#allocation5 + $0xa0] sm:$0xff]  ;;  %v91_v49 = vld [vmem:[#allocation5 + $0xa8] sm:$0xff] }
  0x2a   :  { %962 = vmatprep.subr.bf16.mxu0 %v1377_v20  ;;  %1025 = vmatprep.subr.bf16.mxu1 %v1379_v21  ;;  %v1353_v52 = vcombine.high %v86_v46, %v90_v47  ;;  %v1355_v53 = vcombine.high %v87_v48, %v91_v49  ;;  %v78_v54 = vld [vmem:[#allocation5 + $0x40] sm:$0xff]  ;;  %v79_v56 = vld [vmem:[#allocation5 + $0x48] sm:$0xff]  ;;  %v1352_v58 = vcombine.low %v86_v46, %v90_v47 }
  0x2b   :  { %990 = vmatprep.mubr.bf16.mxu0 %v1313_v35  ;;  %v82_v55 = vld [vmem:[#allocation5 + $0x60] sm:$0xff]  ;;  %v83_v57 = vld [vmem:[#allocation5 + $0x68] sm:$0xff]  ;;  %v1354_v59 = vcombine.low %v87_v48, %v91_v49 }
  0x2c   :  { %v1345_v60 = vcombine.high %v78_v54, %v82_v55  ;;  %v1347_v61 = vcombine.high %v79_v56, %v83_v57  ;;  %v70_v62 = vld [vmem:[#allocation5] sm:$0xff]  ;;  %v71_v0 = vld [vmem:[#allocation5 + $0x8] sm:$0xff]  ;;  %v1344_v2 = vcombine.low %v78_v54, %v82_v55  ;;  %v1346_v3 = vcombine.low %v79_v56, %v83_v57 }
  0x2d   :  { %v74_v63 = vld [vmem:[#allocation5 + $0x20] sm:$0xff]  ;;  %v75_v1 = vld [vmem:[#allocation5 + $0x28] sm:$0xff] }
  0x2e   :  { %v1337_v4 = vcombine.high %v70_v62, %v74_v63  ;;  %v1339_v5 = vcombine.high %v71_v0, %v75_v1  ;;  %v190_v6 = vld [vmem:[#allocation5 + $0x3c0] sm:$0xff]  ;;  %v191_v8 = vld [vmem:[#allocation5 + $0x3c8] sm:$0xff]  ;;  %v1336_v10 = vcombine.low %v70_v62, %v74_v63  ;;  %v1338_v11 = vcombine.low %v71_v0, %v75_v1 }
  0x2f   :  { %v194_v7 = vld [vmem:[#allocation5 + $0x3e0] sm:$0xff]  ;;  %v195_v9 = vld [vmem:[#allocation5 + $0x3e8] sm:$0xff] }
  0x30   :  { %v1457_v12 = vcombine.high %v190_v6, %v194_v7  ;;  %v1459_v13 = vcombine.high %v191_v8, %v195_v9  ;;  %v182_v14 = vld [vmem:[#allocation5 + $0x380] sm:$0xff]  ;;  %v183_v16 = vld [vmem:[#allocation5 + $0x388] sm:$0xff]  ;;  %v1456_v18 = vcombine.low %v190_v6, %v194_v7  ;;  %v1458_v19 = vcombine.low %v191_v8, %v195_v9 }
  0x31   :  { %963 = vmatpush1.bf16.xpose.msra.mxu0 %v1376_v26  ;;  %1026 = vmatpush1.bf16.xpose.msra.mxu1 %v1378_v27  ;;  %v186_v15 = vld [vmem:[#allocation5 + $0x3a0] sm:$0xff]  ;;  %v187_v17 = vld [vmem:[#allocation5 + $0x3a8] sm:$0xff] }
  0x32   :  { %964 = vmatprep.subr.bf16.mxu0 %v1369_v28  ;;  %1027 = vmatprep.subr.bf16.mxu1 %v1371_v29  ;;  %v1449_v20 = vcombine.high %v182_v14, %v186_v15  ;;  %v1451_v21 = vcombine.high %v183_v16, %v187_v17  ;;  %v174_v22 = vld [vmem:[#allocation5 + $0x340] sm:$0xff]  ;;  %v175_v24 = vld [vmem:[#allocation5 + $0x348] sm:$0xff]  ;;  %v1448_v26 = vcombine.low %v182_v14, %v186_v15  ;;  %v129_v14 = vld [vmem:[#allocation5 + $0x1d8] sm:$0xff] }
  0x33   :  { %v178_v23 = vld [vmem:[#allocation5 + $0x360] sm:$0xff]  ;;  %v179_v25 = vld [vmem:[#allocation5 + $0x368] sm:$0xff]  ;;  %v1450_v27 = vcombine.low %v183_v16, %v187_v17  ;;  %v133_v15 = vld [vmem:[#allocation5 + $0x1f8] sm:$0xff] }
  0x34   :  { %v1441_v28 = vcombine.high %v174_v22, %v178_v23  ;;  %v1443_v29 = vcombine.high %v175_v24, %v179_v25  ;;  %v166_v30 = vld [vmem:[#allocation5 + $0x300] sm:$0xff]  ;;  %v167_v35 = vld [vmem:[#allocation5 + $0x308] sm:$0xff]  ;;  %v1440_v39 = vcombine.low %v174_v22, %v178_v23  ;;  %v1442_v41 = vcombine.low %v175_v24, %v179_v25  ;;  %v1597_v22 = vld [vmem:[#allocation2 + $0x30] sm:$0xff] }
  0x35   :  { %v170_v33 = vld [vmem:[#allocation5 + $0x320] sm:$0xff]  ;;  %v171_v38 = vld [vmem:[#allocation5 + $0x328] sm:$0xff]  ;;  %v1599_v23 = vld [vmem:[#allocation2 + $0x18] sm:$0xff] }
  0x36   :  { %v159_v46 = vld [vmem:[#allocation5 + $0x2c8] sm:$0xff]  ;;  %v1432_v48 = vcombine.low %v166_v30, %v170_v33  ;;  %v1434_v49 = vcombine.low %v167_v35, %v171_v38  ;;  %v124_v24 = vld [vmem:[#allocation5 + $0x1b0] sm:$0xff]  ;;  %v121_v25 = vld [vmem:[#allocation5 + $0x198] sm:$0xff] }
  0x37   :  { %v163_v47 = vld [vmem:[#allocation5 + $0x2e8] sm:$0xff] }
  0x38   :  { %v151_v54 = vld [vmem:[#allocation5 + $0x288] sm:$0xff]  ;;  %v1426_v57 = vcombine.low %v159_v46, %v163_v47 }
  0x39   :  { %965 = vmatpush1.bf16.xpose.msra.mxu0 %v1368_v42  ;;  %1028 = vmatpush1.bf16.xpose.msra.mxu1 %v1370_v43  ;;  %v1433_v42 = vcombine.high %v166_v30, %v170_v33  ;;  %v1435_v43 = vcombine.high %v167_v35, %v171_v38  ;;  %v155_v55 = vld [vmem:[#allocation5 + $0x2a8] sm:$0xff]  ;;  %v58_v30 = vld [vmem:[#allocation2 + $0x60] sm:$0xff] }
  0x3a   :  { %966 = vmatprep.subr.bf16.mxu0 %v1361_v44  ;;  %1029 = vmatprep.subr.bf16.mxu1 %v1363_v45  ;;  %v158_v44 = vld [vmem:[#allocation5 + $0x2c0] sm:$0xff]  ;;  %v143_v62 = vld [vmem:[#allocation5 + $0x248] sm:$0xff]  ;;  %v1418_v1 = vcombine.low %v151_v54, %v155_v55 }
  0x3b   :  { %v162_v45 = vld [vmem:[#allocation5 + $0x2e0] sm:$0xff]  ;;  %v147_v63 = vld [vmem:[#allocation5 + $0x268] sm:$0xff] }
  0x3c   :  { %v1424_v56 = vcombine.low %v158_v44, %v162_v45  ;;  %v135_v6 = vld [vmem:[#allocation5 + $0x208] sm:$0xff]  ;;  %v1410_v9 = vcombine.low %v143_v62, %v147_v63 }
  0x3d   :  { %v139_v7 = vld [vmem:[#allocation5 + $0x228] sm:$0xff] }
  0x3e   :  { %v1402_v17 = vcombine.low %v135_v6, %v139_v7  ;;  %v55_v38 = vld [vmem:[#allocation2 + $0x48] sm:$0xff] }
  0x41   :  { %967 = vmatpush1.bf16.xpose.msra.mxu0 %v1360_v50  ;;  %1030 = vmatpush1.bf16.xpose.msra.mxu1 %v1362_v51  ;;  %v1425_v50 = vcombine.high %v158_v44, %v162_v45  ;;  %v1427_v51 = vcombine.high %v159_v46, %v163_v47  ;;  %v112_v46 = vld [vmem:[#allocation5 + $0x150] sm:$0xff] }
  0x42   :  { %968 = vmatprep.subr.bf16.mxu0 %v1353_v52  ;;  %1031 = vmatprep.subr.bf16.mxu1 %v1355_v53  ;;  %v150_v52 = vld [vmem:[#allocation5 + $0x280] sm:$0xff]  ;;  %v116_v47 = vld [vmem:[#allocation5 + $0x170] sm:$0xff] }
  0x43   :  { %v154_v53 = vld [vmem:[#allocation5 + $0x2a0] sm:$0xff]  ;;  %v1381_v36 = vcombine.high %v112_v46, %v116_v47 }
  0x44   :  { %v1416_v0 = vcombine.low %v150_v52, %v154_v53 }
  0x49   :  { %969 = vmatpush1.bf16.xpose.msra.mxu0 %v1352_v58  ;;  %1032 = vmatpush1.bf16.xpose.msra.mxu1 %v1354_v59  ;;  %v1417_v58 = vcombine.high %v150_v52, %v154_v53  ;;  %v1419_v59 = vcombine.high %v151_v54, %v155_v55  ;;  %v66_v52 = vld [vmem:[#allocation2 + $0xa0] sm:$0xff]  ;;  %v67_v53 = vld [vmem:[#allocation2 + $0xa8] sm:$0xff] }
  0x4a   :  { %970 = vmatprep.subr.bf16.mxu0 %v1345_v60  ;;  %1033 = vmatprep.subr.bf16.mxu1 %v1347_v61  ;;  %v142_v60 = vld [vmem:[#allocation5 + $0x240] sm:$0xff] }
  0x4b   :  { %v146_v61 = vld [vmem:[#allocation5 + $0x260] sm:$0xff] }
  0x4c   :  { %v1408_v8 = vcombine.low %v142_v60, %v146_v61 }
  0x51   :  { %971 = vmatpush1.bf16.xpose.msra.mxu0 %v1344_v2  ;;  %1034 = vmatpush1.bf16.xpose.msra.mxu1 %v1346_v3  ;;  %v1409_v2 = vcombine.high %v142_v60, %v146_v61  ;;  %v1411_v3 = vcombine.high %v143_v62, %v147_v63  ;;  %v1380_v61 = vcombine.low %v112_v46, %v116_v47 }
  0x52   :  { %972 = vmatprep.subr.bf16.mxu0 %v1337_v4  ;;  %1035 = vmatprep.subr.bf16.mxu1 %v1339_v5  ;;  %v134_v4 = vld [vmem:[#allocation5 + $0x200] sm:$0xff] }
  0x53   :  { %v138_v5 = vld [vmem:[#allocation5 + $0x220] sm:$0xff] }
  0x54   :  { %v1400_v16 = vcombine.low %v134_v4, %v138_v5 }
  0x59   :  { %973 = vmatpush1.bf16.xpose.msra.mxu0 %v1336_v10  ;;  %1036 = vmatpush1.bf16.xpose.msra.mxu1 %v1338_v11  ;;  %v1401_v10 = vcombine.high %v134_v4, %v138_v5  ;;  %v1403_v11 = vcombine.high %v135_v6, %v139_v7  ;;  %v96_v4 = vld [vmem:[#allocation5 + $0xd0] sm:$0xff]  ;;  %v97_v6 = vld [vmem:[#allocation5 + $0xd8] sm:$0xff] }
  0x5a   :  { %974 = vmatprep.subr.bf16.mxu0 %v1457_v12  ;;  %1037 = vmatprep.subr.bf16.mxu1 %v1459_v13  ;;  %v128_v12 = vld [vmem:[#allocation5 + $0x1d0] sm:$0xff]  ;;  %v101_v7 = vld [vmem:[#allocation5 + $0xf8] sm:$0xff] }
  0x5b   :  { %v132_v13 = vld [vmem:[#allocation5 + $0x1f0] sm:$0xff] }
  0x5c   :  { %v1396_v35 = vcombine.low %v128_v12, %v132_v13  ;;  %v100_v5 = vld [vmem:[#allocation5 + $0xf0] sm:$0xff] }
  0x61   :  { %975 = vmatpush2.bf16.xpose.msra.mxu0 %v1456_v18  ;;  %1038 = vmatpush2.bf16.xpose.msra.mxu1 %v1458_v19  ;;  %v1397_v18 = vcombine.high %v128_v12, %v132_v13  ;;  %v1399_v19 = vcombine.high %v129_v14, %v133_v15  ;;  %v88_v12 = vld [vmem:[#allocation5 + $0x90] sm:$0xff] }
  0x62   :  { %976 = vmatprep.subr.bf16.mxu0 %v1449_v20  ;;  %1039 = vmatprep.subr.bf16.mxu1 %v1451_v21  ;;  %v120_v20 = vld [vmem:[#allocation5 + $0x190] sm:$0xff] }
  0x63   :  { %v1595_v21 = vld [vmem:[#allocation2 + $0x10] sm:$0xff]  ;;  %v1388_v31 = vcombine.low %v120_v20, %v124_v24 }
  0x64   :  { %v92_v13 = vld [vmem:[#allocation5 + $0xb0] sm:$0xff] }
  0x69   :  { %977 = vmatpush2.bf16.xpose.msra.mxu0 %v1448_v26  ;;  %1040 = vmatpush2.bf16.xpose.msra.mxu1 %v1450_v27  ;;  %v1316_v26 = vcombine.low %v1595_v21, %v1597_v22  ;;  %v1603_v27 = vld [vmem:[#allocation2 + $0x38] sm:$0xff] }
  0x6a   :  { %978 = vmatprep.subr.bf16.mxu0 %v1441_v28  ;;  %1041 = vmatprep.subr.bf16.mxu1 %v1443_v29  ;;  %v125_v28 = vld [vmem:[#allocation5 + $0x1b8] sm:$0xff]  ;;  %v54_v29 = vld [vmem:[#allocation2 + $0x40] sm:$0xff]  ;;  %v1318_v33 = vcombine.low %v1599_v23, %v1603_v27 }
  0x6b   :  { %v1321_v44 = vcombine.high %v54_v29, %v58_v30  ;;  %v1390_v54 = vcombine.low %v121_v25, %v125_v28 }
  0x71   :  { %979 = vmatpush2.bf16.xpose.msra.mxu0 %v1440_v39  ;;  %1042 = vmatpush2.bf16.xpose.msra.mxu1 %v1442_v41  ;;  %v59_v39 = vld [vmem:[#allocation2 + $0x68] sm:$0xff]  ;;  %v1398_v41 = vcombine.low %v129_v14, %v133_v15  ;;  %v89_v14 = vld [vmem:[#allocation5 + $0x98] sm:$0xff] }
  0x72   :  { %980 = vmatprep.subr.bf16.mxu0 %v1433_v42  ;;  %1043 = vmatprep.subr.bf16.mxu1 %v1435_v43  ;;  %v1389_v42 = vcombine.high %v120_v20, %v124_v24  ;;  %v1391_v43 = vcombine.high %v121_v25, %v125_v28  ;;  %v1323_v45 = vcombine.high %v55_v38, %v59_v39  ;;  %v93_v15 = vld [vmem:[#allocation5 + $0xb8] sm:$0xff]  ;;  %v80_v20 = vld [vmem:[#allocation5 + $0x50] sm:$0xff] }
  0x73   :  { %v1322_v32 = vcombine.low %v55_v38, %v59_v39  ;;  %v84_v24 = vld [vmem:[#allocation5 + $0x70] sm:$0xff]  ;;  %v81_v25 = vld [vmem:[#allocation5 + $0x58] sm:$0xff] }
  0x74   :  { %v85_v28 = vld [vmem:[#allocation5 + $0x78] sm:$0xff]  ;;  %v72_v39 = vld [vmem:[#allocation5 + $0x10] sm:$0xff] }
  0x75   :  { %v1351_v38 = vcombine.high %v81_v25, %v85_v28 }
  0x79   :  { %981 = vmatpush2.bf16.xpose.msra.mxu0 %v1432_v48  ;;  %1044 = vmatpush2.bf16.xpose.msra.mxu1 %v1434_v49  ;;  %v113_v48 = vld [vmem:[#allocation5 + $0x158] sm:$0xff] }
  0x7a   :  { %982 = vmatprep.subr.bf16.mxu0 %v1425_v50  ;;  %1045 = vmatprep.subr.bf16.mxu1 %v1427_v51  ;;  %v117_v49 = vld [vmem:[#allocation5 + $0x178] sm:$0xff]  ;;  %v1320_v50 = vcombine.low %v54_v29, %v58_v30  ;;  %v62_v51 = vld [vmem:[#allocation2 + $0x80] sm:$0xff]  ;;  %v1356_v29 = vcombine.low %v88_v12, %v92_v13  ;;  %v1358_v30 = vcombine.low %v89_v14, %v93_v15 }
  0x7b   :  { %v1383_v37 = vcombine.high %v113_v48, %v117_v49  ;;  %v1328_v60 = vcombine.low %v62_v51, %v66_v52  ;;  %v1382_v63 = vcombine.low %v113_v48, %v117_v49  ;;  %v192_v48 = vld [vmem:[#allocation5 + $0x3d0] sm:$0xff] }
  0x7c   :  { %v196_v49 = vld [vmem:[#allocation5 + $0x3f0] sm:$0xff] }
  0x81   :  { %983 = vmatpush2.bf16.xpose.msra.mxu0 %v1424_v56  ;;  %1046 = vmatpush2.bf16.xpose.msra.mxu1 %v1426_v57  ;;  %v104_v56 = vld [vmem:[#allocation5 + $0x110] sm:$0xff] }
  0x82   :  { %984 = vmatprep.subr.bf16.mxu0 %v1417_v58  ;;  %1047 = vmatprep.subr.bf16.mxu1 %v1419_v59  ;;  %v108_v57 = vld [vmem:[#allocation5 + $0x130] sm:$0xff]  ;;  %v105_v58 = vld [vmem:[#allocation5 + $0x118] sm:$0xff] }
  0x83   :  { %v109_v59 = vld [vmem:[#allocation5 + $0x138] sm:$0xff] }
  0x89   :  { %985 = vmatpush2.bf16.xpose.msra.mxu0 %v1416_v0  ;;  %1048 = vmatpush2.bf16.xpose.msra.mxu1 %v1418_v1  ;;  %v1373_v0 = vcombine.high %v104_v56, %v108_v57  ;;  %v1375_v1 = vcombine.high %v105_v58, %v109_v59 }
  0x8a   :  { %986 = vmatprep.subr.bf16.mxu0 %v1409_v2  ;;  %1049 = vmatprep.subr.bf16.mxu1 %v1411_v3  ;;  %v1317_v2 = vcombine.high %v1595_v21, %v1597_v22  ;;  %v1319_v3 = vcombine.high %v1599_v23, %v1603_v27 }
  0x91   :  { %987 = vmatpush2.bf16.xpose.msra.mxu0 %v1408_v8  ;;  %1050 = vmatpush2.bf16.xpose.msra.mxu1 %v1410_v9  ;;  %v1372_v8 = vcombine.low %v104_v56, %v108_v57  ;;  %v1374_v9 = vcombine.low %v105_v58, %v109_v59  ;;  %v176_v58 = vld [vmem:[#allocation5 + $0x350] sm:$0xff] }
  0x92   :  { %988 = vmatprep.subr.bf16.mxu0 %v1401_v10  ;;  %1051 = vmatprep.subr.bf16.mxu1 %v1403_v11  ;;  %v1365_v10 = vcombine.high %v96_v4, %v100_v5  ;;  %v1367_v11 = vcombine.high %v97_v6, %v101_v7  ;;  %v180_v59 = vld [vmem:[#allocation5 + $0x370] sm:$0xff] }
  0x99   :  { %989 = vmatpush2.bf16.xpose.msra.mxu0 %v1400_v16  ;;  %1052 = vmatpush2.bf16.xpose.msra.mxu1 %v1402_v17  ;;  %v1364_v16 = vcombine.low %v96_v4, %v100_v5  ;;  %v1366_v17 = vcombine.low %v97_v6, %v101_v7  ;;  %v1212_v4 = vld [vmem:[%s1689_s2 + $0x10] sm:$0xff]  ;;  %v169_v7 = vld [vmem:[#allocation5 + $0x318] sm:$0xff] }
  0x9a   :  { %1084 = vmatprep.subr.bf16.mxu0 %v1397_v18  ;;  %1147 = vmatprep.subr.bf16.mxu1 %v1399_v19  ;;  %v1357_v18 = vcombine.high %v88_v12, %v92_v13  ;;  %v1359_v19 = vcombine.high %v89_v14, %v93_v15  ;;  %v168_v5 = vld [vmem:[#allocation5 + $0x310] sm:$0xff]  ;;  %v1213_v13 = vld [vmem:[%s1689_s2 + $0x18] sm:$0xff]  ;;  %v1214_v15 = vld [vmem:[%s1689_s2 + $0x20] sm:$0xff] }
  0x9b   :  { %v172_v6 = vld [vmem:[#allocation5 + $0x330] sm:$0xff] }
  0x9c   :  { %v1437_v12 = vcombine.high %v168_v5, %v172_v6 }
  0xa0   :  { %991 = vmatmul.mubr.bf16.vlgmr.msra.gmra.mxu0 %v1312_v34  ;;  %1054 = vmatmul.mubr.bf16.vlgmr.msra.gmra.mxu1 %v1314_v40  ;;  %v63_v34 = vld [vmem:[#allocation2 + $0x88] sm:$0xff]  ;;  %v1329_v40 = vcombine.high %v62_v51, %v66_v52  ;;  %v197_v51 = vld [vmem:[#allocation5 + $0x3f8] sm:$0xff] }
  0xa1   :  { %1085 = vmatpush1.bf16.xpose.msra.mxu0 %v1396_v35  ;;  %1148 = vmatpush1.bf16.xpose.msra.mxu1 %v1398_v41  ;;  %v1331_v55 = vcombine.high %v63_v34, %v67_v53  ;;  %v1330_v62 = vcombine.low %v63_v34, %v67_v53  ;;  %v1349_v35 = vcombine.high %v80_v20, %v84_v24  ;;  %v76_v41 = vld [vmem:[#allocation5 + $0x30] sm:$0xff] }
  0xa2   :  { %1086 = vmatprep.subr.bf16.mxu0 %v1389_v42  ;;  %1149 = vmatprep.subr.bf16.mxu1 %v1391_v43  ;;  %v73_v42 = vld [vmem:[#allocation5 + $0x18] sm:$0xff]  ;;  %v1341_v46 = vcombine.high %v72_v39, %v76_v41  ;;  %v1340_v52 = vcombine.low %v72_v39, %v76_v41  ;;  %v184_v53 = vld [vmem:[#allocation5 + $0x390] sm:$0xff] }
  0xa3   :  { %1000 = vmatprep.mubr.bf16.mxu0 %v1321_v44  ;;  %1063 = vmatprep.mubr.bf16.mxu1 %v1323_v45  ;;  %v77_v43 = vld [vmem:[#allocation5 + $0x38] sm:$0xff]  ;;  %v1348_v44 = vcombine.low %v80_v20, %v84_v24  ;;  %v1350_v45 = vcombine.low %v81_v25, %v85_v28  ;;  %v1436_v24 = vcombine.low %v168_v5, %v172_v6 }
  0xa4   :  { %v1343_v47 = vcombine.high %v73_v42, %v77_v43  ;;  %v165_v20 = vld [vmem:[#allocation5 + $0x2f8] sm:$0xff] }
  0xa5   :  { %v157_v39 = vld [vmem:[#allocation5 + $0x2b8] sm:$0xff] }
  0xa8   :  { %1001 = vmatmul.mubr.bf16.gmra.mxu0 %v1320_v50  ;;  %1064 = vmatmul.mubr.bf16.gmra.mxu1 %v1322_v32  ;;  %v193_v50 = vld [vmem:[#allocation5 + $0x3d8] sm:$0xff]  ;;  %v1461_v32 = vcombine.high %v192_v48, %v196_v49 }
  0xa9   :  { %1087 = vmatpush1.bf16.xpose.msra.mxu0 %v1388_v31  ;;  %1150 = vmatpush1.bf16.xpose.msra.mxu1 %v1390_v54  ;;  %v1342_v31 = vcombine.low %v73_v42, %v77_v43  ;;  %v1463_v34 = vcombine.high %v193_v50, %v197_v51  ;;  %v188_v54 = vld [vmem:[#allocation5 + $0x3b0] sm:$0xff] }
  0xaa   :  { %1088 = vmatprep.subr.bf16.mxu0 %v1381_v36  ;;  %1151 = vmatprep.subr.bf16.mxu1 %v1383_v37  ;;  %v185_v36 = vld [vmem:[#allocation5 + $0x398] sm:$0xff]  ;;  %v1453_v56 = vcombine.high %v184_v53, %v188_v54 }
  0xab   :  { %1010 = vmatprep.mubr.bf16.mxu0 %v1329_v40  ;;  %1073 = vmatprep.mubr.bf16.mxu1 %v1331_v55  ;;  %v189_v37 = vld [vmem:[#allocation5 + $0x3b8] sm:$0xff]  ;;  %v1460_v40 = vcombine.low %v192_v48, %v196_v49  ;;  %v1462_v55 = vcombine.low %v193_v50, %v197_v51 }
  0xac   :  { %v1455_v57 = vcombine.high %v185_v36, %v189_v37  ;;  %v149_v48 = vld [vmem:[#allocation5 + $0x278] sm:$0xff] }
  0xb0   :  { %1011 = vmatmul.mubr.bf16.gmra.mxu0 %v1328_v60  ;;  %1074 = vmatmul.mubr.bf16.gmra.mxu1 %v1330_v62  ;;  %v177_v60 = vld [vmem:[#allocation5 + $0x358] sm:$0xff]  ;;  %v1452_v62 = vcombine.low %v184_v53, %v188_v54 }
  0xb1   :  { %1089 = vmatpush1.bf16.xpose.msra.mxu0 %v1380_v61  ;;  %1152 = vmatpush1.bf16.xpose.msra.mxu1 %v1382_v63  ;;  %v181_v61 = vld [vmem:[#allocation5 + $0x378] sm:$0xff]  ;;  %v1454_v63 = vcombine.low %v185_v36, %v189_v37 }
  0xb2   :  { %1090 = vmatprep.subr.bf16.mxu0 %v1373_v0  ;;  %1153 = vmatprep.subr.bf16.mxu1 %v1375_v1  ;;  %v1445_v0 = vcombine.high %v176_v58, %v180_v59  ;;  %v1447_v1 = vcombine.high %v177_v60, %v181_v61  ;;  %v141_v53 = vld [vmem:[#allocation5 + $0x238] sm:$0xff] }
  0xb3   :  { %1116 = vmatprep.mubr.bf16.mxu0 %v1317_v2  ;;  %1179 = vmatprep.mubr.bf16.mxu1 %v1319_v3  ;;  %v1210_v2 = vld [vmem:[%s1689_s2] sm:$0xff]  ;;  %v1544_v3 = vmov 0  }
  0xb4   :  { %1472 = vset.pattern.permute.xlu0 %v1544_v3  ;;  %1473 = vset.pattern.permute.xlu1 %v1544_v3 }
  0xb5   :  { %1218 = vperm.xlu0 %1472, %v1210_v2   ;;  %1228 = vperm.xlu1 %1473, %v1212_v4   ;;  %v69_v2 = vld [vmem:[#allocation2 + $0xb8] sm:$0xff] }
  0xb9   :  { %1091 = vmatpush1.bf16.xpose.msra.mxu0 %v1372_v8  ;;  %1154 = vmatpush1.bf16.xpose.msra.mxu1 %v1374_v9  ;;  %v173_v8 = vld [vmem:[#allocation5 + $0x338] sm:$0xff]  ;;  %v1211_v9 = vld [vmem:[%s1689_s2 + $0x8] sm:$0xff] }
  0xba   :  { %1092 = vmatprep.subr.bf16.mxu0 %v1365_v10  ;;  %1155 = vmatprep.subr.bf16.mxu1 %v1367_v11  ;;  %v1444_v10 = vcombine.low %v176_v58, %v180_v59  ;;  %v1446_v11 = vcombine.low %v177_v60, %v181_v61  ;;  %v1439_v14 = vcombine.high %v169_v7, %v173_v8  ;;  %v60_v58 = vld [vmem:[#allocation2 + $0x70] sm:$0xff]  ;;  %v57_v59 = vld [vmem:[#allocation2 + $0x58] sm:$0xff] }
  0xbb   :  { %1223 = vperm.xlu0 %1472, %v1211_v9   ;;  %1233 = vperm.xlu1 %1473, %v1213_v13   ;;  %v1438_v25 = vcombine.low %v169_v7, %v173_v8  ;;  %v61_v60 = vld [vmem:[#allocation2 + $0x78] sm:$0xff] }
  0xbc   :  { %v1326_v4 = vcombine.low %v57_v59, %v61_v60 }
  0xbf   :  { %1238 = vperm.xlu0 %1472, %v1214_v15  }
  0xc1   :  { %1093 = vmatpush1.bf16.xpose.msra.mxu0 %v1364_v16  ;;  %1156 = vmatpush1.bf16.xpose.msra.mxu1 %v1366_v17  ;;  %v1215_v16 = vld [vmem:[%s1689_s2 + $0x28] sm:$0xff]  ;;  %v160_v17 = vld [vmem:[#allocation5 + $0x2d0] sm:$0xff] }
  0xc2   :  { %1094 = vmatprep.subr.bf16.mxu0 %v1357_v18  ;;  %1157 = vmatprep.subr.bf16.mxu1 %v1359_v19  ;;  %v164_v18 = vld [vmem:[#allocation5 + $0x2f0] sm:$0xff]  ;;  %v161_v19 = vld [vmem:[#allocation5 + $0x2d8] sm:$0xff] }
  0xc3   :  { %1243 = vperm.xlu1 %1473, %v1215_v16   ;;  %v1429_v28 = vcombine.high %v160_v17, %v164_v18  ;;  %v1428_v41 = vcombine.low %v160_v17, %v164_v18  ;;  %v1430_v42 = vcombine.low %v161_v19, %v165_v20 }
  0xc9   :  { %1095 = vmatpush1.bf16.xpose.msra.mxu0 %v1356_v29  ;;  %1158 = vmatpush1.bf16.xpose.msra.mxu1 %v1358_v30  ;;  %v1431_v29 = vcombine.high %v161_v19, %v165_v20  ;;  %v152_v30 = vld [vmem:[#allocation5 + $0x290] sm:$0xff] }
  0xca   :  { %1096 = vmatprep.subr.bf16.mxu0 %v1349_v35  ;;  %1159 = vmatprep.subr.bf16.mxu1 %v1351_v38  ;;  %v156_v35 = vld [vmem:[#allocation5 + $0x2b0] sm:$0xff]  ;;  %v153_v38 = vld [vmem:[#allocation5 + $0x298] sm:$0xff] }
  0xcb   :  { %v1421_v43 = vcombine.high %v152_v30, %v156_v35  ;;  %v1420_v49 = vcombine.low %v152_v30, %v156_v35  ;;  %v1422_v50 = vcombine.low %v153_v38, %v157_v39 }
  0xd1   :  { %1097 = vmatpush1.bf16.xpose.msra.mxu0 %v1348_v44  ;;  %1160 = vmatpush1.bf16.xpose.msra.mxu1 %v1350_v45  ;;  %v1423_v44 = vcombine.high %v153_v38, %v157_v39  ;;  %v144_v45 = vld [vmem:[#allocation5 + $0x250] sm:$0xff] }
  0xd2   :  { %1098 = vmatprep.subr.bf16.mxu0 %v1341_v46  ;;  %1161 = vmatprep.subr.bf16.mxu1 %v1343_v47  ;;  %v148_v46 = vld [vmem:[#allocation5 + $0x270] sm:$0xff]  ;;  %v145_v47 = vld [vmem:[#allocation5 + $0x258] sm:$0xff] }
  0xd3   :  { %v1413_v51 = vcombine.high %v144_v45, %v148_v46  ;;  %v1412_v54 = vcombine.low %v144_v45, %v148_v46  ;;  %v1414_v36 = vcombine.low %v145_v47, %v149_v48 }
  0xd9   :  { %1099 = vmatpush1.bf16.xpose.msra.mxu0 %v1340_v52  ;;  %1162 = vmatpush1.bf16.xpose.msra.mxu1 %v1342_v31  ;;  %v1415_v52 = vcombine.high %v145_v47, %v149_v48  ;;  %v136_v31 = vld [vmem:[#allocation5 + $0x210] sm:$0xff] }
  0xda   :  { %1100 = vmatprep.subr.bf16.mxu0 %v1461_v32  ;;  %1163 = vmatprep.subr.bf16.mxu1 %v1463_v34  ;;  %v140_v32 = vld [vmem:[#allocation5 + $0x230] sm:$0xff]  ;;  %v137_v34 = vld [vmem:[#allocation5 + $0x218] sm:$0xff] }
  0xdb   :  { %v1405_v37 = vcombine.high %v136_v31, %v140_v32 }
  0xe1   :  { %1101 = vmatpush2.bf16.xpose.msra.mxu0 %v1460_v40  ;;  %1164 = vmatpush2.bf16.xpose.msra.mxu1 %v1462_v55  ;;  %v1407_v40 = vcombine.high %v137_v34, %v141_v53  ;;  %v1404_v55 = vcombine.low %v136_v31, %v140_v32 }
  0xe2   :  { %1102 = vmatprep.subr.bf16.mxu0 %v1453_v56  ;;  %1165 = vmatprep.subr.bf16.mxu1 %v1455_v57  ;;  %v1406_v56 = vcombine.low %v137_v34, %v141_v53  ;;  %v56_v57 = vld [vmem:[#allocation2 + $0x50] sm:$0xff] }
  0xe3   :  { %v1325_v61 = vcombine.high %v56_v57, %v60_v58  ;;  %v1324_v3 = vcombine.low %v56_v57, %v60_v58 }
  0xe9   :  { %1103 = vmatpush2.bf16.xpose.msra.mxu0 %v1452_v62  ;;  %1166 = vmatpush2.bf16.xpose.msra.mxu1 %v1454_v63  ;;  %v1327_v62 = vcombine.high %v57_v59, %v61_v60  ;;  %v64_v63 = vld [vmem:[#allocation2 + $0x90] sm:$0xff] }
  0xea   :  { %1104 = vmatprep.subr.bf16.mxu0 %v1445_v0  ;;  %1167 = vmatprep.subr.bf16.mxu1 %v1447_v1  ;;  %v68_v0 = vld [vmem:[#allocation2 + $0xb0] sm:$0xff]  ;;  %v65_v1 = vld [vmem:[#allocation2 + $0x98] sm:$0xff] }
  0xeb   :  { %v1333_v5 = vcombine.high %v64_v63, %v68_v0  ;;  %v1335_v6 = vcombine.high %v65_v1, %v69_v2  ;;  %v1332_v21 = vcombine.low %v64_v63, %v68_v0  ;;  %v1334_v22 = vcombine.low %v65_v1, %v69_v2 }
  0xf1   :  { %1105 = vmatpush2.bf16.xpose.msra.mxu0 %v1444_v10  ;;  %1168 = vmatpush2.bf16.xpose.msra.mxu1 %v1446_v11 }
  0xf2   :  { %1106 = vmatprep.subr.bf16.mxu0 %v1437_v12  ;;  %1169 = vmatprep.subr.bf16.mxu1 %v1439_v14 }
  0xf9   :  { %1107 = vmatpush2.bf16.xpose.msra.mxu0 %v1436_v24  ;;  %1170 = vmatpush2.bf16.xpose.msra.mxu1 %v1438_v25 }
  0xfa   :  { %1108 = vmatprep.subr.bf16.mxu0 %v1429_v28  ;;  %1171 = vmatprep.subr.bf16.mxu1 %v1431_v29  ;;  %v1260_v28 = vlaneseq }
  0xfc   :  { %v1261_v35 = vshrl.u32 %v1260_v28, 7 }
  0xfe   :  { %v1266_v45 = vsub.s32 1, %v1261_v35 }
 0x101   :  { %1109 = vmatpush2.bf16.xpose.msra.mxu0 %v1428_v41  ;;  %1172 = vmatpush2.bf16.xpose.msra.mxu1 %v1430_v42  ;;  %v1262_v42 = vsub.s32 0, %v1261_v35 }
 0x102   :  { %1110 = vmatprep.subr.bf16.mxu0 %v1421_v43  ;;  %1173 = vmatprep.subr.bf16.mxu1 %v1423_v44  ;;  %v1258_v44 = vld [vmem:[%s1690_s3] sm:$0x3]  ;;  %s1545_s3 = smov [#allocation7]  }
 0x103   :  { %v1660_v34 = vrot.slane %v1258_v44, %v1262_v42  ;;  %v1662_v53 = vrot.slane %v1258_v44, %v1266_v45  ;;  %s1299_s12 = sshll.u32 %s1545_s3, 4  ;;  %s1300_s12 = int_to_ptr.vmem [resolvable:$true] %s1299_s12 }
 0x104   :  { %s1514_s13 = scalar_lea.vmem %s1300_s12, 1536  ;;  %p1519_p11 = scmp.lt.s32.totalorder %s1300_s12, %s1300_s12 }
 0x105   :  { %p1515_p10 = scmp.ne.s32.totalorder %s1300_s12, %s1514_s13  ;;  %p1520_p12 = scmp.lt.s32.totalorder %s1514_s13, %s1514_s13 }
 0x107   :  { %p1521_p13 = por %p1520_p12, %p1519_p11 }
 0x109   :  { %1111 = vmatpush2.bf16.xpose.msra.mxu0 %v1420_v49  ;;  %1174 = vmatpush2.bf16.xpose.msra.mxu1 %v1422_v50  ;;  %p1522_p0 = pnand %p1521_p13, %p1515_p10 }
 0x10a   :  { %1112 = vmatprep.subr.bf16.mxu0 %v1413_v51  ;;  %1175 = vmatprep.subr.bf16.mxu1 %v1415_v52 }
 0x111   :  { %1113 = vmatpush2.bf16.xpose.msra.mxu0 %v1412_v54  ;;  %1176 = vmatpush2.bf16.xpose.msra.mxu1 %v1414_v36 }
 0x112   :  { %1114 = vmatprep.subr.bf16.mxu0 %v1405_v37  ;;  %1177 = vmatprep.subr.bf16.mxu1 %v1407_v40 }
 0x119   :  { %1115 = vmatpush2.bf16.xpose.msra.mxu0 %v1404_v55  ;;  %1178 = vmatpush2.bf16.xpose.msra.mxu1 %v1406_v56 }
 0x120   :  { %1117 = vmatmul.mubr.bf16.vlgmr.msra.gmra.mxu0 %v1316_v26  ;;  %1180 = vmatmul.mubr.bf16.vlgmr.msra.gmra.mxu1 %v1318_v33 }
 0x121   :  { %1126 = vmatprep.mubr.bf16.mxu0 %v1325_v61  ;;  %1189 = vmatprep.mubr.bf16.mxu1 %v1327_v62 }
 0x128   :  { %1127 = vmatmul.mubr.bf16.gmra.mxu0 %v1324_v3  ;;  %1190 = vmatmul.mubr.bf16.gmra.mxu1 %v1326_v4 }
 0x129   :  { %1136 = vmatprep.mubr.bf16.mxu0 %v1333_v5  ;;  %1199 = vmatprep.mubr.bf16.mxu1 %v1335_v6 }
 0x130   :  { %1137 = vmatmul.mubr.bf16.gmra.mxu0 %v1332_v21  ;;  %1200 = vmatmul.mubr.bf16.gmra.mxu1 %v1334_v22  ;;  %v1219_v46 = vpop.permute.xlu0 %1218 }
 0x136   :  { %v1224_v59 = vpop.permute.xlu0 %1223 }
 0x160   :  { %v992_v23 = vpop.f32.mrf.mxu0  ;;  %v1055_v26 = vpop.f32.mrf.mxu1 }
 0x161   :  { %v1056_v39 = vadd.f32 %v1055_v26, %v992_v23  ;;  %v1229_v23 = vpop.permute.xlu1 %1228 }
 0x162   :  { %v994_v27 = vpop.f32.mrf.mxu0  ;;  %v1057_v33 = vpop.f32.mrf.mxu1 }
 0x163   :  { %v1058_v47 = vadd.f32 %v1057_v33, %v994_v27 }
 0x164   :  { %v996_v7 = vpop.f32.mrf.mxu0  ;;  %v1059_v8 = vpop.f32.mrf.mxu1 }
 0x165   :  { %v1060_v51 = vadd.f32 %v1059_v8, %v996_v7 }
 0x166   :  { %v998_v9 = vpop.f32.mrf.mxu0  ;;  %v1061_v10 = vpop.f32.mrf.mxu1 }
 0x167   :  { %v1062_v36 = vadd.f32 %v1061_v10, %v998_v9 }
 0x168   :  { %v1002_v11 = vpop.f32.mrf.mxu0  ;;  %v1065_v12 = vpop.f32.mrf.mxu1 }
 0x169   :  { %v1066_v57 = vadd.f32 %v1065_v12, %v1002_v11 }
 0x16a   :  { %v1004_v13 = vpop.f32.mrf.mxu0  ;;  %v1067_v14 = vpop.f32.mrf.mxu1 }
 0x16b   :  { %v1068_v1 = vadd.f32 %v1067_v14, %v1004_v13 }
 0x16c   :  { %v1006_v15 = vpop.f32.mrf.mxu0  ;;  %v1069_v16 = vpop.f32.mrf.mxu1 }
 0x16d   :  { %v1070_v22 = vadd.f32 %v1069_v16, %v1006_v15 }
 0x16e   :  { %v1008_v17 = vpop.f32.mrf.mxu0  ;;  %v1071_v18 = vpop.f32.mrf.mxu1 }
 0x16f   :  { %v1072_v10 = vadd.f32 %v1071_v18, %v1008_v17  ;;  %v1234_v18 = vpop.permute.xlu1 %1233 }
 0x170   :  { %v1641_v19 = vpop.f32.mrf.mxu0  ;;  %v1643_v20 = vpop.f32.mrf.mxu1 }
 0x171   :  { %v1076_v15 = vadd.f32 %v1643_v20, %v1641_v19 }
 0x172   :  { %v1645_v24 = vpop.f32.mrf.mxu0  ;;  %v1647_v25 = vpop.f32.mrf.mxu1 }
 0x173   :  { %v1078_v17 = vadd.f32 %v1647_v25, %v1645_v24 }
 0x174   :  { %v1649_v29 = vpop.f32.mrf.mxu0  ;;  %v1651_v30 = vpop.f32.mrf.mxu1 }
 0x175   :  { %v1080_v20 = vadd.f32 %v1651_v30, %v1649_v29 }
 0x176   :  { %v1653_v38 = vpop.f32.mrf.mxu0  ;;  %v1655_v41 = vpop.f32.mrf.mxu1 }
 0x177   :  { %v1082_v25 = vadd.f32 %v1655_v41, %v1653_v38 }
 0x1e0   :  { %v1118_v43 = vpop.f32.mrf.mxu0  ;;  %v1181_v49 = vpop.f32.mrf.mxu1 }
 0x1e1   :  { %v1119_v48 = vadd.f32 %v1118_v43, %v1056_v39 }
 0x1e2   :  { %v1120_v50 = vpop.f32.mrf.mxu0  ;;  %v1183_v32 = vpop.f32.mrf.mxu1 }
 0x1e3   :  { %v1182_v52 = vadd.f32 %v1181_v49, %v1119_v48  ;;  %v1121_v31 = vadd.f32 %v1120_v50, %v1058_v47 }
 0x1e4   :  { %v1122_v54 = vpop.f32.mrf.mxu0  ;;  %v1185_v56 = vpop.f32.mrf.mxu1 }
 0x1e5   :  { %v1184_v37 = vadd.f32 %v1183_v32, %v1121_v31  ;;  %v1246_v40 = vmul.f32 %v1219_v46, %v1182_v52  ;;  %v1123_v55 = vadd.f32 %v1122_v54, %v1060_v51 }
 0x1e6   :  { %v1124_v58 = vpop.f32.mrf.mxu0  ;;  %v1187_v0 = vpop.f32.mrf.mxu1 }
 0x1e7   :  { %v1247_v60 = vmul.f32 %v1219_v46, %v1184_v37  ;;  %v1270_v61 = vmul.f32 %v1660_v34, %v1246_v40  ;;  %v1186_v62 = vadd.f32 %v1185_v56, %v1123_v55  ;;  %v1125_v63 = vadd.f32 %v1124_v58, %v1062_v36  ;;  %v1239_v36 = vpop.permute.xlu0 %1238 }
 0x1e8   :  { %v1128_v2 = vpop.f32.mrf.mxu0  ;;  %v1191_v21 = vpop.f32.mrf.mxu1 }
 0x1e9   :  { %v1271_v3 = vmul.f32 %v1662_v53, %v1247_v60  ;;  %1282 = vst [vmem:[#allocation7] sm:$0xff] %v1270_v61  ;;  %v1188_v4 = vadd.f32 %v1187_v0, %v1125_v63  ;;  %v1248_v5 = vmul.f32 %v1224_v59, %v1186_v62  ;;  %v1129_v6 = vadd.f32 %v1128_v2, %v1066_v57  ;;  %v1244_v62 = vpop.permute.xlu1 %1243 }
 0x1ea   :  { %v1130_v26 = vpop.f32.mrf.mxu0  ;;  %v1193_v9 = vpop.f32.mrf.mxu1 }
 0x1eb   :  { %1283 = vst [vmem:[#allocation7 + $0x8] sm:$0xff] %v1271_v3  ;;  %v1249_v27 = vmul.f32 %v1224_v59, %v1188_v4  ;;  %v1272_v33 = vmul.f32 %v1660_v34, %v1248_v5  ;;  %v1192_v7 = vadd.f32 %v1191_v21, %v1129_v6  ;;  %v1131_v8 = vadd.f32 %v1130_v26, %v1068_v1 }
 0x1ec   :  { %v1132_v11 = vpop.f32.mrf.mxu0  ;;  %v1195_v35 = vpop.f32.mrf.mxu1 }
 0x1ed   :  { %v1273_v12 = vmul.f32 %v1662_v53, %v1249_v27  ;;  %1284 = vst [vmem:[#allocation7 + $0x10] sm:$0xff] %v1272_v33  ;;  %v1250_v13 = vmul.f32 %v1229_v23, %v1192_v7  ;;  %v1194_v14 = vadd.f32 %v1193_v9, %v1131_v8  ;;  %v1133_v28 = vadd.f32 %v1132_v11, %v1070_v22 }
 0x1ee   :  { %v1134_v16 = vpop.f32.mrf.mxu0  ;;  %v1197_v45 = vpop.f32.mrf.mxu1 }
 0x1ef   :  { %1285 = vst [vmem:[#allocation7 + $0x18] sm:$0xff] %v1273_v12  ;;  %v1274_v39 = vmul.f32 %v1660_v34, %v1250_v13  ;;  %v1251_v42 = vmul.f32 %v1229_v23, %v1194_v14  ;;  %v1196_v43 = vadd.f32 %v1195_v35, %v1133_v28  ;;  %v1135_v44 = vadd.f32 %v1134_v16, %v1072_v10 }
 0x1f0   :  { %v1138_v46 = vpop.f32.mrf.mxu0  ;;  %v1201_v19 = vpop.f32.mrf.mxu1 }
 0x1f1   :  { %1286 = vst [vmem:[#allocation7 + $0x20] sm:$0xff] %v1274_v39  ;;  %v1275_v47 = vmul.f32 %v1662_v53, %v1251_v42  ;;  %v1252_v48 = vmul.f32 %v1234_v18, %v1196_v43  ;;  %v1198_v49 = vadd.f32 %v1197_v45, %v1135_v44  ;;  %v1139_v50 = vadd.f32 %v1138_v46, %v1076_v15 }
 0x1f2   :  { %v1140_v51 = vpop.f32.mrf.mxu0  ;;  %v1203_v24 = vpop.f32.mrf.mxu1 }
 0x1f3   :  { %1287 = vst [vmem:[#allocation7 + $0x28] sm:$0xff] %v1275_v47  ;;  %v1276_v52 = vmul.f32 %v1660_v34, %v1252_v48  ;;  %v1253_v31 = vmul.f32 %v1234_v18, %v1198_v49  ;;  %v1202_v32 = vadd.f32 %v1201_v19, %v1139_v50  ;;  %v1141_v54 = vadd.f32 %v1140_v51, %v1078_v17 }
 0x1f4   :  { %v1142_v37 = vpop.f32.mrf.mxu0  ;;  %v1205_v29 = vpop.f32.mrf.mxu1 }
 0x1f5   :  { %1288 = vst [vmem:[#allocation7 + $0x30] sm:$0xff] %v1276_v52  ;;  %v1277_v40 = vmul.f32 %v1662_v53, %v1253_v31  ;;  %v1254_v55 = vmul.f32 %v1239_v36, %v1202_v32  ;;  %v1204_v56 = vadd.f32 %v1203_v24, %v1141_v54  ;;  %v1143_v57 = vadd.f32 %v1142_v37, %v1080_v20 }
 0x1f6   :  { %v1144_v30 = vpop.f32.mrf.mxu0  ;;  %v1207_v63 = vpop.f32.mrf.mxu1 }
 0x1f7   :  { %1289 = vst [vmem:[#allocation7 + $0x38] sm:$0xff] %v1277_v40  ;;  %v1278_v58 = vmul.f32 %v1660_v34, %v1254_v55  ;;  %v1255_v59 = vmul.f32 %v1239_v36, %v1204_v56  ;;  %v1206_v60 = vadd.f32 %v1205_v29, %v1143_v57  ;;  %v1145_v61 = vadd.f32 %v1144_v30, %v1082_v25 }
 0x1f9   :  { %1290 = vst [vmem:[#allocation7 + $0x40] sm:$0xff] %v1278_v58  ;;  %v1279_v38 = vmul.f32 %v1662_v53, %v1255_v59  ;;  %v1256_v41 = vmul.f32 %v1244_v62, %v1206_v60  ;;  %v1208_v0 = vadd.f32 %v1207_v63, %v1145_v61 }
 0x1fb   :  { %1291 = vst [vmem:[#allocation7 + $0x48] sm:$0xff] %v1279_v38  ;;  %v1280_v1 = vmul.f32 %v1660_v34, %v1256_v41  ;;  %v1257_v2 = vmul.f32 %v1244_v62, %v1208_v0 }
 0x1fd   :  { %1292 = vst [vmem:[#allocation7 + $0x50] sm:$0xff] %v1280_v1  ;;  %v1281_v3 = vmul.f32 %v1662_v53, %v1257_v2 }
 0x1ff   :  { %1293 = vst [vmem:[#allocation7 + $0x58] sm:$0xff] %v1281_v3 }
 0x200   :  { %1525 = shalt.err (!%p1522_p0)
}
 0x201   :  { %s1546_s14 = smov 256   ;;  %s1547_s15 = smov 16  }
 0x202   :  { %1305 = dma.vmem_to_hbm [thread:$0]  %s1300_s12, 1536, %s1691_s4, [#allocation4], %s1546_s14, %s1546_s14, %s1547_s15  }
 0x203   :  { %1538 = dma.done.wait [#allocation4], 1536  }
 0x204   :  { %1539 = vsyncadd [#allocation4], 4294965760 }
 0x205   :  { %1309 = vsyncpa [#allocation3], 1 }
 0x206   :  { %1310 = vsyncpa [#allocation6], 1 }
 0x207   :  { %1311 = vsyncpa [#allocation4], 1 }

</bundles_post_ra>
